<compile_context>
chip_gen: v7x
topology: tpu7x:2x2x1
jax: 0.10.0
libtpu: 0.0.40
codegen_flags: <defaults>
</compile_context>

<pallas_src>
import functools

import numpy as np
import jax
import jax.numpy as jnp
from jax.experimental import pallas as pl
from jax.experimental.pallas import tpu as pltpu

IN_EPS = 1e-5  # nn.InstanceNorm2d default eps


# ---------------------------------------------------------------------------
# Pallas kernel: fused style-linear + instance-norm + affine modulation.
# ---------------------------------------------------------------------------
def _adain_kernel(x_ref, s_ref, wg_ref, wb_ref, bg_ref, bb_ref, o_ref, *, eps):
    # x block: (TB, TC, HW) in the input's native dtype; upcast in vregs only.
    x = x_ref[...].astype(jnp.float32)
    s = s_ref[...].astype(jnp.float32)                     # (TB, 1, S)

    # Folded EqualLinear (equal_lr scale baked into wg/wb).  Broadcast-multiply +
    # lane reduction keeps gamma/beta on the sublane (channel) axis with no relayout
    # and stays off the MXU: (1,TC,S)*(TB,1,S) -> sum over lanes -> (TB, TC, 1).
    gamma = jnp.sum(wg_ref[...][None, :, :] * s, axis=-1, keepdims=True) + bg_ref[...][None]
    beta = jnp.sum(wb_ref[...][None, :, :] * s, axis=-1, keepdims=True) + bb_ref[...][None]

    # InstanceNorm2d statistics in a single pass over the tile: sum and sum-of-squares.
    inv_hw = 1.0 / x.shape[-1]
    mean = jnp.sum(x, axis=-1, keepdims=True) * inv_hw
    ex2 = jnp.sum(x * x, axis=-1, keepdims=True) * inv_hw
    var = jnp.maximum(ex2 - mean * mean, 0.0)              # clamp: no NaN from tiny negatives

    scale = gamma * jax.lax.rsqrt(var + eps)               # rsqrt -> EUP slot
    shift = beta - scale * mean                            # fold mean into the affine
    o_ref[...] = (x * scale + shift).astype(o_ref.dtype)   # single lane-dense store


# ---------------------------------------------------------------------------
# VMEM-aware tile selection.
# ---------------------------------------------------------------------------
def _vmem_budget_bytes():
    cap = 64 * 1024 * 1024  # conservative fallback = v7x per-core VMEM
    try:
        cap = int(pltpu.get_tpu_info().vmem_capacity_bytes)
    except Exception:
        pass
    # leave headroom for compiler scratch: 128 MiB (v5e/v6e) -> 96 MiB, 64 MiB (v7x) -> 48 MiB
    return (cap * 3) // 4


def _block_footprint(tile_b, tile_c, HW, S, x_itemsize):
    xio = 2 * 2 * tile_b * tile_c * HW * x_itemsize   # double-buffered in + out blocks
    f32_tmp = 2 * tile_b * tile_c * HW * 4            # in-kernel f32 upcast / result temps
    w = 2 * 2 * tile_c * S * 4                        # wg + wb blocks, double-buffered
    misc = 2 * (2 * tile_c * 4 + tile_b * S * 4) + (1 << 20)   # biases, style, slack
    return xio + f32_tmp + w + misc


def _choose_tiles(B, C, HW, S, x_itemsize, budget):
    # Channel-tile candidates: full C, or multiple-of-8 divisors of C (layout constraint).
    c_cands = sorted({C} | {t for t in range(8, C, 8) if C % t == 0}, reverse=True)
    tile_c = None
    for tc in c_cands:
        if _block_footprint(1, tc, HW, S, x_itemsize) <= budget:
            tile_c = tc
            break
    if tile_c is None:
        tile_c = c_cands[-1]  # smallest legal channel tile
        # TODO(synk): for extreme spatial sizes where even one 8-channel row exceeds the
        # VMEM budget, add an HW grid axis ('arbitrary') with sum/sumsq scratch
        # accumulators (stats pass, then normalize pass).
    # Pack multiple batch elements per step when the whole channel extent fits,
    # amortizing per-grid-step overhead on small feature maps.
    tile_b = 1
    if tile_c == C:
        for tb in sorted((t for t in range(1, B + 1) if B % t == 0), reverse=True):
            if _block_footprint(tb, tile_c, HW, S, x_itemsize) <= budget:
                tile_b = tb
                break
    return tile_b, tile_c


# ---------------------------------------------------------------------------
# Wrapper: layout plumbing + pallas_call.
# ---------------------------------------------------------------------------
def adaptive_instance_norm(x, style, params, *, eps=IN_EPS):
    """x: [B, C, H, W], style: [B, S] -> [B, C, H, W] (same dtype as x)."""
    B, C, H, W = x.shape
    S = style.shape[1]
    HW = H * W

    # Native-dtype I/O: spatial axis -> lanes (lane-dense); no f32 copy in HBM.
    xf = x.reshape(B, C, HW)
    sf = style.reshape(B, 1, S)

    budget = _vmem_budget_bytes()
    tile_b, tile_c = _choose_tiles(B, C, HW, S, jnp.dtype(x.dtype).itemsize, budget)

    # Batch innermost: the wg/wb/bg/bb block indices depend only on the (outer) channel
    # tile, so those blocks are revisited across the inner batch loop, not re-fetched.
    grid = (C // tile_c, B // tile_b)

    out = pl.pallas_call(
        functools.partial(_adain_kernel, eps=eps),
        out_shape=jax.ShapeDtypeStruct((B, C, HW), x.dtype),
        grid=grid,
        in_specs=[
            pl.BlockSpec((tile_b, tile_c, HW), lambda c, b: (b, c, 0)),   # x tile
            pl.BlockSpec((tile_b, 1, S), lambda c, b: (b, 0, 0)),         # style rows
            pl.BlockSpec((tile_c, S), lambda c, b: (c, 0)),               # gamma weights
            pl.BlockSpec((tile_c, S), lambda c, b: (c, 0)),               # beta weights
            pl.BlockSpec((tile_c, 1), lambda c, b: (c, 0)),               # gamma bias
            pl.BlockSpec((tile_c, 1), lambda c, b: (c, 0)),               # beta bias
        ],
        out_specs=pl.BlockSpec((tile_b, tile_c, HW), lambda c, b: (b, c, 0)),
        compiler_params=pltpu.CompilerParams(
            dimension_semantics=("parallel", "parallel"),
            vmem_limit_bytes=budget),
    )(xf, sf, params['wg'], params['wb'], params['bg'], params['bb'])

    return out.reshape(B, C, H, W)


# ---------------------------------------------------------------------------
# Parameter construction mirroring the PyTorch module init, with equal_lr folded.
# ---------------------------------------------------------------------------
def init_params(key, in_channel, style_dim):
    # EqualLinear: linear.weight.data.normal_(), bias zero; AdaptiveInstanceNorm then
    # sets bias[:C] = 1, bias[C:] = 0.  equal_lr scales only the weight by
    # sqrt(2 / fan_in) with fan_in = style_dim.
    w_orig = jax.random.normal(key, (2 * in_channel, style_dim), jnp.float32)
    w_eff = w_orig * np.sqrt(2.0 / style_dim)
    bias = jnp.concatenate([jnp.ones((in_channel,), jnp.float32),
                            jnp.zeros((in_channel,), jnp.float32)])
    return {
        'wg': w_eff[:in_channel],                       # [C, S] rows producing gamma
        'wb': w_eff[in_channel:],                       # [C, S] rows producing beta
        'bg': bias[:in_channel].reshape(-1, 1),         # [C, 1]
        'bb': bias[in_channel:].reshape(-1, 1),         # [C, 1]
    }


# ---------------------------------------------------------------------------
# Pure-JAX reference (same folded parameters) for a numerical sanity check.
# ---------------------------------------------------------------------------
def reference_forward(x, style, params, eps=IN_EPS):
    x32 = x.astype(jnp.float32)
    s32 = style.astype(jnp.float32)
    gamma = s32 @ params['wg'].T + params['bg'][:, 0][None, :]   # [B, C]
    beta = s32 @ params['wb'].T + params['bb'][:, 0][None, :]    # [B, C]
    mean = x32.mean(axis=(2, 3), keepdims=True)
    var = x32.var(axis=(2, 3), keepdims=True)                    # biased variance
    norm = (x32 - mean) / jnp.sqrt(var + eps)
    out = gamma[:, :, None, None] * norm + beta[:, :, None, None]
    return out.astype(x.dtype)


if __name__ == "__main__":
    B, C, S, H, W = 2, 8, 32, 16, 16
    key = jax.random.PRNGKey(0)
    kx, ks, kp = jax.random.split(key, 3)
    x = jax.random.normal(kx, (B, C, H, W), jnp.float32)
    style = jax.random.normal(ks, (B, S), jnp.float32)
    params = init_params(kp, C, S)

    out = adaptive_instance_norm(x, style, params)
    out = jax.block_until_ready(out)
    assert out.shape == (B, C, H, W) and out.dtype == x.dtype

    ref = reference_forward(x, style, params)
    np.testing.assert_allclose(np.asarray(out), np.asarray(ref), rtol=2e-3, atol=2e-3)

    print("KERNEL_OK")
</pallas_src>

<mosaic_0001>
module attributes {stable_mosaic.version = 11 : i64} {
  func.func @_adain_kernel(%arg0: i32, %arg1: i32, %arg2: memref<2x8x256xf32, #tpu.memory_space<vmem>>, %arg3: memref<2x1x32xf32, #tpu.memory_space<vmem>>, %arg4: memref<8x32xf32, #tpu.memory_space<vmem>>, %arg5: memref<8x32xf32, #tpu.memory_space<vmem>>, %arg6: memref<8x1xf32, #tpu.memory_space<vmem>>, %arg7: memref<8x1xf32, #tpu.memory_space<vmem>>, %arg8: memref<2x8x256xf32, #tpu.memory_space<vmem>>) attributes {dimension_semantics = [#tpu.dimension_semantics<parallel>, #tpu.dimension_semantics<parallel>], iteration_bounds = array<i64: 1, 1>, scalar_prefetch = 0 : i64, scratch_operands = 0 : i64, tpu.core_type = #tpu.core_type<tc>, window_params = [{transform_indices = @transform_0, window_bounds = array<i64: 2, 8, 256>}, {transform_indices = @transform_1, window_bounds = array<i64: 2, 1, 32>}, {transform_indices = @transform_2, window_bounds = array<i64: 8, 32>}, {transform_indices = @transform_3, window_bounds = array<i64: 8, 32>}, {transform_indices = @transform_4, window_bounds = array<i64: 8, 1>}, {transform_indices = @transform_5, window_bounds = array<i64: 8, 1>}, {transform_indices = @transform_6, window_bounds = array<i64: 2, 8, 256>}]} {
    %c0 = arith.constant 0 : index
    %c0_0 = arith.constant 0 : index
    %c0_1 = arith.constant 0 : index
    %0 = vector.load %arg2[%c0, %c0_0, %c0_1] : memref<2x8x256xf32, #tpu.memory_space<vmem>>, vector<2x8x256xf32>
    %c0_2 = arith.constant 0 : index
    %c0_3 = arith.constant 0 : index
    %c0_4 = arith.constant 0 : index
    %1 = vector.load %arg3[%c0_2, %c0_3, %c0_4] : memref<2x1x32xf32, #tpu.memory_space<vmem>>, vector<2x1x32xf32>
    %c0_5 = arith.constant 0 : index
    %c0_6 = arith.constant 0 : index
    %2 = vector.load %arg4[%c0_5, %c0_6] : memref<8x32xf32, #tpu.memory_space<vmem>>, vector<8x32xf32>
    %3 = vector.shape_cast %2 : vector<8x32xf32> to vector<1x8x32xf32>
    %4 = vector.broadcast %3 : vector<1x8x32xf32> to vector<2x8x32xf32>
    %5 = vector.broadcast %1 : vector<2x1x32xf32> to vector<2x8x32xf32>
    %6 = arith.mulf %4, %5 : vector<2x8x32xf32>
    %cst = arith.constant dense<0.000000e+00> : vector<2x8xf32>
    %7 = vector.multi_reduction <add>, %6, %cst [2] : vector<2x8x32xf32> to vector<2x8xf32>
    %8 = vector.shape_cast %7 : vector<2x8xf32> to vector<2x8x1xf32>
    %c0_7 = arith.constant 0 : index
    %c0_8 = arith.constant 0 : index
    %9 = vector.load %arg6[%c0_7, %c0_8] : memref<8x1xf32, #tpu.memory_space<vmem>>, vector<8x1xf32>
    %10 = vector.shape_cast %9 : vector<8x1xf32> to vector<1x8x1xf32>
    %11 = vector.broadcast %10 : vector<1x8x1xf32> to vector<2x8x1xf32>
    %12 = arith.addf %8, %11 : vector<2x8x1xf32>
    %c0_9 = arith.constant 0 : index
    %c0_10 = arith.constant 0 : index
    %13 = vector.load %arg5[%c0_9, %c0_10] : memref<8x32xf32, #tpu.memory_space<vmem>>, vector<8x32xf32>
    %14 = vector.shape_cast %13 : vector<8x32xf32> to vector<1x8x32xf32>
    %15 = vector.broadcast %14 : vector<1x8x32xf32> to vector<2x8x32xf32>
    %16 = vector.broadcast %1 : vector<2x1x32xf32> to vector<2x8x32xf32>
    %17 = arith.mulf %15, %16 : vector<2x8x32xf32>
    %cst_11 = arith.constant dense<0.000000e+00> : vector<2x8xf32>
    %18 = vector.multi_reduction <add>, %17, %cst_11 [2] : vector<2x8x32xf32> to vector<2x8xf32>
    %19 = vector.shape_cast %18 : vector<2x8xf32> to vector<2x8x1xf32>
    %c0_12 = arith.constant 0 : index
    %c0_13 = arith.constant 0 : index
    %20 = vector.load %arg7[%c0_12, %c0_13] : memref<8x1xf32, #tpu.memory_space<vmem>>, vector<8x1xf32>
    %21 = vector.shape_cast %20 : vector<8x1xf32> to vector<1x8x1xf32>
    %22 = vector.broadcast %21 : vector<1x8x1xf32> to vector<2x8x1xf32>
    %23 = arith.addf %19, %22 : vector<2x8x1xf32>
    %cst_14 = arith.constant dense<0.000000e+00> : vector<2x8xf32>
    %24 = vector.multi_reduction <add>, %0, %cst_14 [2] : vector<2x8x256xf32> to vector<2x8xf32>
    %25 = vector.shape_cast %24 : vector<2x8xf32> to vector<2x8x1xf32>
    %cst_15 = arith.constant 3.906250e-03 : f32
    %26 = vector.broadcast %cst_15 : f32 to vector<2x8x1xf32>
    %27 = arith.mulf %25, %26 : vector<2x8x1xf32>
    %28 = arith.mulf %0, %0 : vector<2x8x256xf32>
    %cst_16 = arith.constant dense<0.000000e+00> : vector<2x8xf32>
    %29 = vector.multi_reduction <add>, %28, %cst_16 [2] : vector<2x8x256xf32> to vector<2x8xf32>
    %30 = vector.shape_cast %29 : vector<2x8xf32> to vector<2x8x1xf32>
    %cst_17 = arith.constant 3.906250e-03 : f32
    %31 = vector.broadcast %cst_17 : f32 to vector<2x8x1xf32>
    %32 = arith.mulf %30, %31 : vector<2x8x1xf32>
    %33 = arith.mulf %27, %27 : vector<2x8x1xf32>
    %34 = arith.subf %32, %33 : vector<2x8x1xf32>
    %cst_18 = arith.constant 0.000000e+00 : f32
    %35 = vector.broadcast %cst_18 : f32 to vector<2x8x1xf32>
    %36 = arith.maximumf %34, %35 : vector<2x8x1xf32>
    %cst_19 = arith.constant 9.99999974E-6 : f32
    %37 = vector.broadcast %cst_19 : f32 to vector<2x8x1xf32>
    %38 = arith.addf %36, %37 : vector<2x8x1xf32>
    %39 = math.rsqrt %38 : vector<2x8x1xf32>
    %40 = arith.mulf %12, %39 : vector<2x8x1xf32>
    %41 = arith.mulf %40, %27 : vector<2x8x1xf32>
    %42 = arith.subf %23, %41 : vector<2x8x1xf32>
    %43 = vector.broadcast %40 : vector<2x8x1xf32> to vector<2x8x256xf32>
    %44 = arith.mulf %0, %43 : vector<2x8x256xf32>
    %45 = vector.broadcast %42 : vector<2x8x1xf32> to vector<2x8x256xf32>
    %46 = arith.addf %44, %45 : vector<2x8x256xf32>
    %c0_20 = arith.constant 0 : index
    %c0_21 = arith.constant 0 : index
    %c0_22 = arith.constant 0 : index
    %47 = vector.load %arg8[%c0_20, %c0_21, %c0_22] : memref<2x8x256xf32, #tpu.memory_space<vmem>>, vector<2x8x256xf32>
    tpu.vector_store %arg8[%c0_20, %c0_21, %c0_22], %46 {strides = array<i32>} : memref<2x8x256xf32, #tpu.memory_space<vmem>>, vector<2x8x256xf32>,
    return
  }
  func.func @transform_0(%arg0: i32, %arg1: i32) -> (i32, i32, i32) {
    %c0_i32 = arith.constant 0 : i32
    %c0_i32_0 = arith.constant 0 : i32
    return %arg1, %arg0, %c0_i32 : i32, i32, i32
  }
  func.func @transform_1(%arg0: i32, %arg1: i32) -> (i32, i32, i32) {
    %c0_i32 = arith.constant 0 : i32
    %c0_i32_0 = arith.constant 0 : i32
    %c0_i32_1 = arith.constant 0 : i32
    return %arg1, %c0_i32, %c0_i32_0 : i32, i32, i32
  }
  func.func @transform_2(%arg0: i32, %arg1: i32) -> (i32, i32) {
    %c0_i32 = arith.constant 0 : i32
    %c0_i32_0 = arith.constant 0 : i32
    return %arg0, %c0_i32 : i32, i32
  }
  func.func @transform_3(%arg0: i32, %arg1: i32) -> (i32, i32) {
    %c0_i32 = arith.constant 0 : i32
    %c0_i32_0 = arith.constant 0 : i32
    return %arg0, %c0_i32 : i32, i32
  }
  func.func @transform_4(%arg0: i32, %arg1: i32) -> (i32, i32) {
    %c0_i32 = arith.constant 0 : i32
    %c0_i32_0 = arith.constant 0 : i32
    return %arg0, %c0_i32 : i32, i32
  }
  func.func @transform_5(%arg0: i32, %arg1: i32) -> (i32, i32) {
    %c0_i32 = arith.constant 0 : i32
    %c0_i32_0 = arith.constant 0 : i32
    return %arg0, %c0_i32 : i32, i32
  }
  func.func @transform_6(%arg0: i32, %arg1: i32) -> (i32, i32, i32) {
    %c0_i32 = arith.constant 0 : i32
    %c0_i32_0 = arith.constant 0 : i32
    return %arg1, %arg0, %c0_i32 : i32, i32, i32
  }
}

</mosaic_0001>

<bundles_post_ra>
// kernel: tpu_custom_call.1
= control target key start
LH: loop header
LB: loop body
LE: loop exit
PB: predicated region body
PF: predicated region fallthrough
CT: control target
= control target key end

     0   :  { %11 = vsyncpa [#allocation3], 0  ;;  %s339_s0 = inlined_call_operand.hbm [shape: f32[2,8,256], index: 0, kind: input, shape index: {}]   ;;  %s340_s1 = inlined_call_operand.vmem [shape: f32[2,1,32], index: 1, kind: input, shape index: {}]   ;;  %s341_s2 = inlined_call_operand.vmem [shape: f32[8,32], index: 2, kind: input, shape index: {}]   ;;  %s342_s3 = inlined_call_operand.vmem [shape: f32[8,32], index: 3, kind: input, shape index: {}]   ;;  %s343_s4 = inlined_call_operand.vmem [shape: f32[8,1], index: 4, kind: input, shape index: {}]   ;;  %s344_s5 = inlined_call_operand.vmem [shape: f32[8,1], index: 5, kind: input, shape index: {}]   ;;  %s345_s6 = inlined_call_operand.hbm [shape: f32[2,8,256], index: 6, kind: output, shape index: {}]  }
   0x1   :  { %12 = vsyncpa [#allocation4], 0  ;;  %s227_s21 = smov [#allocation2]   ;;  %s179_s25 = scalar_lea.hbm %s339_s0, 512 }
   0x2   :  { %s18_s22 = sshll.u32 %s227_s21, 4  ;;  %p180_p0 = scmp.ne.s32.totalorder %s339_s0, %s179_s25  ;;  %s19_s22 = int_to_ptr.vmem [resolvable:$true] %s18_s22 }
   0x3   :  { %p183_p1 = scmp.lt.u32.totalorder %s179_s25, %s339_s0 }
   0x5   :  { %p185_p2 = pnand %p183_p1, %p180_p0 }
   0x7   :  { %188 = shalt.err (!%p185_p2)
}
   0x8   :  { %s189_s30 = scalar_lea.vmem %s19_s22, 512  ;;  %p194_p4 = scmp.lt.s32.totalorder %s19_s22, %s19_s22 }
   0x9   :  { %p190_p3 = scmp.ne.s32.totalorder %s19_s22, %s189_s30  ;;  %p195_p5 = scmp.lt.s32.totalorder %s189_s30, %s189_s30 }
   0xb   :  { %p196_p6 = por %p195_p5, %p194_p4 }
   0xd   :  { %p197_p7 = pnand %p196_p6, %p190_p3 }
   0xf   :  { %200 = shalt.err (!%p197_p7)
}
  0x10   :  { %s228_s7 = smov 256   ;;  %s229_s8 = smov 16  }
  0x11   :  { %24 = dma.hbm_to_vmem [thread:$0]  %s339_s0, 512, %s19_s22, [#allocation3], %s228_s7, %s228_s7, %s229_s8  }
  0x12   :  { %223 = dma.done.wait [#allocation3], 512  }
  0x13   :  { %224 = vsyncadd [#allocation3], 4294966784  ;;  %v282_v0 = vld [vmem:[#allocation2] sm:$0xff]  ;;  %v284_v1 = vld [vmem:[#allocation2 + $0x8] sm:$0xff]  ;;  %vm59_vm0 = vcmask 261120   ;;  %v230_v24 = vmov 0  }
  0x14   :  { %v286_v2 = vld [vmem:[#allocation2 + $0x10] sm:$0xff]  ;;  %v81_v3 = vadd.f32 %v284_v1, %v282_v0  ;;  %v89_v4 = vmul.f32 %v282_v0, %v282_v0  ;;  %v90_v5 = vmul.f32 %v284_v1, %v284_v1  ;;  %v294_v6 = vld [vmem:[#allocation2 + $0x18] sm:$0xff]  ;;  %v166_v8 = vld [vmem:[%s340_s1] ss:$0 sm:$0xff]  ;;  %173 = vset.pattern.permute.xlu0 %v230_v24  ;;  %174 = vset.pattern.permute.xlu1 %v230_v24 }
  0x15   :  { %v91_v7 = vmul.f32 %v286_v2, %v286_v2  ;;  %v44_v9 = vld [vmem:[%s341_s2] sm:$0xff]  ;;  %v92_v10 = vmul.f32 %v294_v6, %v294_v6  ;;  %v84_v12 = vadd.f32 %v294_v6, %v286_v2 }
  0x16   :  { %82 = vadd.xlane.f32.xlu0 %v81_v3  ;;  %v93_v11 = vadd.f32 %v90_v5, %v89_v4  ;;  %v167_v13 = vld [vmem:[%s340_s1 + $0x1] ss:$0 sm:$0xff]  ;;  %v57_v14 = vmul.f32 %v166_v8, %v44_v9 }
  0x17   :  { %v96_v15 = vadd.f32 %v92_v10, %v91_v7  ;;  %v69_v16 = vld [vmem:[%s342_s3] sm:$0xff]  ;;  %v58_v17 = vmul.f32 %v167_v13, %v44_v9 }
  0x18   :  { %94 = vadd.xlane.f32.xlu1 %v93_v11  ;;  %v60_v18 = vsel %vm59_vm0, %v57_v14, 0.0  ;;  %v70_v19 = vmul.f32 %v166_v8, %v69_v16  ;;  %v71_v21 = vmul.f32 %v167_v13, %v69_v16  ;;  %v66_v41 = vld [vmem:[%s343_s4] sm:$0xff]  ;;  %s231_s4 = smov [#allocation5]  }
  0x19   :  { %v63_v20 = vsel %vm59_vm0, %v58_v17, 0.0  ;;  %v78_v48 = vld [vmem:[%s344_s5] sm:$0xff]  ;;  %s154_s5 = sshll.u32 %s231_s4, 4  ;;  %s155_s5 = int_to_ptr.vmem [resolvable:$true] %s154_s5 }
  0x1a   :  { %85 = vadd.xlane.f32.xlu0 %v84_v12  ;;  %v72_v22 = vsel %vm59_vm0, %v70_v19, 0.0  ;;  %v75_v23 = vsel %vm59_vm0, %v71_v21, 0.0  ;;  %s201_s19 = scalar_lea.vmem %s155_s5, 512  ;;  %p206_p9 = scmp.lt.s32.totalorder %s155_s5, %s155_s5 }
  0x1b   :  { %p202_p8 = scmp.ne.s32.totalorder %s155_s5, %s201_s19  ;;  %p207_p10 = scmp.lt.s32.totalorder %s201_s19, %s201_s19 }
  0x1c   :  { %97 = vadd.xlane.f32.xlu1 %v96_v15 }
  0x1d   :  { %p208_p11 = por %p207_p10, %p206_p9 }
  0x1e   :  { %61 = vadd.xlane.f32.xlu0 %v60_v18 }
  0x1f   :  { %p209_p12 = pnand %p208_p11, %p202_p8 }
  0x20   :  { %64 = vadd.xlane.f32.xlu1 %v63_v20 }
  0x22   :  { %73 = vadd.xlane.f32.xlu0 %v72_v22 }
  0x24   :  { %76 = vadd.xlane.f32.xlu1 %v75_v23 }
  0xa3   :  { %v83_v25 = vpop.xlane.xlu0 %82 }
  0xa4   :  { %v87_v26 = vmul.f32 0.00390625, %v83_v25 }
  0xa5   :  { %v95_v27 = vpop.xlane.xlu1 %94 }
  0xa6   :  { %v101_v28 = vmul.f32 %v87_v26, %v87_v26  ;;  %v99_v29 = vmul.f32 0.00390625, %v95_v27 }
  0xa7   :  { %v86_v30 = vpop.xlane.xlu0 %85 }
  0xa8   :  { %v103_v31 = vsub.f32 %v99_v29, %v101_v28  ;;  %v88_v32 = vmul.f32 0.00390625, %v86_v30 }
  0xa9   :  { %v98_v33 = vpop.xlane.xlu1 %97 }
  0xaa   :  { %v105_v34 = vmax.f32 %v103_v31, 0.0  ;;  %v102_v35 = vmul.f32 %v88_v32, %v88_v32  ;;  %v100_v36 = vmul.f32 0.00390625, %v98_v33 }
  0xab   :  { %v62_v42 = vpop.xlane.xlu0 %61 }
  0xac   :  { %v107_v37 = vadd.f32 1e-05, %v105_v34  ;;  %v104_v38 = vsub.f32 %v100_v36, %v102_v35  ;;  %v67_v43 = vadd.f32 %v66_v41, %v62_v42 }
  0xad   :  { %v65_v44 = vpop.xlane.xlu1 %64 }
  0xae   :  { %175 = vrsqrt.f32 %v107_v37  ;;  %v106_v39 = vmax.f32 %v104_v38, 0.0  ;;  %v68_v47 = vadd.f32 %v66_v41, %v65_v44 }
  0xaf   :  { %v74_v49 = vpop.xlane.xlu0 %73 }
  0xb0   :  { %v108_v40 = vadd.f32 1e-05, %v106_v39  ;;  %v79_v53 = vadd.f32 %v78_v48, %v74_v49 }
  0xb1   :  { %v77_v54 = vpop.xlane.xlu1 %76 }
  0xb2   :  { %177 = vrsqrt.f32 %v108_v40  ;;  %v80_v56 = vadd.f32 %v78_v48, %v77_v54 }
  0xb8   :  { %v176_v45 = vpop.eup %175 }
  0xb9   :  { %v111_v46 = vmul.f32 %v176_v45, %v67_v43 }
  0xbb   :  { %119 = vperm.xlu0 %173, %v111_v46   ;;  %v113_v52 = vmul.f32 %v111_v46, %v87_v26 }
  0xbc   :  { %v178_v50 = vpop.eup %177 }
  0xbd   :  { %v112_v51 = vmul.f32 %v178_v50, %v68_v47  ;;  %v115_v55 = vsub.f32 %v79_v53, %v113_v52 }
  0xbf   :  { %124 = vperm.xlu1 %174, %v112_v51   ;;  %v114_v57 = vmul.f32 %v112_v51, %v88_v32 }
  0xc1   :  { %v116_v58 = vsub.f32 %v80_v56, %v114_v57 }
  0xc3   :  { %133 = vperm.xlu1 %174, %v115_v55  }
  0xc7   :  { %138 = vperm.xlu1 %174, %v116_v58  }
 0x13a   :  { %v120_v59 = vpop.permute.xlu0 %119 }
 0x13b   :  { %v127_v61 = vmul.f32 %v120_v59, %v282_v0  ;;  %v128_v62 = vmul.f32 %v120_v59, %v284_v1 }
 0x13e   :  { %v125_v60 = vpop.permute.xlu1 %124 }
 0x13f   :  { %v129_v5 = vmul.f32 %v125_v60, %v286_v2  ;;  %v130_v7 = vmul.f32 %v125_v60, %v294_v6 }
 0x142   :  { %v134_v63 = vpop.permute.xlu1 %133 }
 0x143   :  { %v141_v3 = vadd.f32 %v134_v63, %v127_v61  ;;  %v142_v4 = vadd.f32 %v134_v63, %v128_v62 }
 0x145   :  { %145 = vst [vmem:[#allocation5] sm:$0xff] %v141_v3  ;;  %146 = vst [vmem:[#allocation5 + $0x8] sm:$0xff] %v142_v4 }
 0x146   :  { %v139_v8 = vpop.permute.xlu1 %138 }
 0x147   :  { %v143_v9 = vadd.f32 %v139_v8, %v129_v5  ;;  %v144_v10 = vadd.f32 %v139_v8, %v130_v7 }
 0x149   :  { %147 = vst [vmem:[#allocation5 + $0x10] sm:$0xff] %v143_v9  ;;  %148 = vst [vmem:[#allocation5 + $0x18] sm:$0xff] %v144_v10 }
 0x14a   :  { %212 = shalt.err (!%p209_p12)
}
 0x14b   :  { %s213_s22 = scalar_lea.hbm %s345_s6, 512 }
 0x14c   :  { %p214_p13 = scmp.ne.s32.totalorder %s345_s6, %s213_s22  ;;  %p217_p0 = scmp.lt.u32.totalorder %s213_s22, %s345_s6 }
 0x14e   :  { %p219_p1 = pnand %p217_p0, %p214_p13 }
 0x150   :  { %222 = shalt.err (!%p219_p1)
}
 0x151   :  { %160 = dma.vmem_to_hbm [thread:$0]  %s155_s5, 512, %s345_s6, [#allocation4], %s228_s7, %s228_s7, %s229_s8  }
 0x152   :  { %225 = dma.done.wait [#allocation4], 512  }
 0x153   :  { %226 = vsyncadd [#allocation4], 4294966784 }
 0x154   :  { %164 = vsyncpa [#allocation3], 1 }
 0x155   :  { %165 = vsyncpa [#allocation4], 1 }

</bundles_post_ra>
